<compile_context>
chip_gen: v6e
topology: v6e:2x2x1
jax: 0.10.0
libtpu: 0.0.40
codegen_flags: <defaults>
</compile_context>

<pallas_src>
import jax
import jax.numpy as jnp
import numpy as np
from jax.experimental import pallas as pl
from jax.experimental.pallas import tpu as pltpu


def _transition_kernel(x_ref, scale_ref, shift_ref, w_ref, o_ref):
    """BN (eval) + ReLU + 2x2 avg-pool + 1x1 conv for one (image, spatial tile)."""
    # x_ref:     (1, 4, C, TS) bf16 -- axis 1 holds the four 2x2-window corners
    # scale_ref: (C, 1) f32 folded BN scale  (gamma / sqrt(var + eps))
    # shift_ref: (C, 1) f32 folded BN shift  (beta - mean * scale)
    # w_ref:     (Cout, C) bf16 1x1-conv weight, pre-scaled by 1/4 (pool factor)
    # o_ref:     (1, Cout, TS) f32
    x = x_ref[0].astype(jnp.float32)                              # (4, C, TS)
    y = jnp.maximum(x * scale_ref[...] + shift_ref[...], 0.0)     # BN + ReLU (f32 VPU)
    # 2x2 average pool = sum of the four window corners (the 1/4 is folded
    # into the conv weight; exact, power-of-two scaling).
    p = (y[0] + y[1] + y[2] + y[3]).astype(jnp.bfloat16)          # (C, TS)
    # 1x1 conv as a single MXU matmul, f32 accumulation, lane-dense output.
    o_ref[0] = jnp.dot(
        w_ref[...], p, preferred_element_type=jnp.float32
    ).astype(o_ref.dtype)


def _choose_spatial_tile(S, bytes_per_col, budget_bytes=2 << 20):
    """Largest tile of the pooled-spatial (lane) axis that divides S, is a
    multiple of 128 (lane-dense stores) or the full extent, and fits a
    conservative VMEM budget (keeps double-buffered tiles well under the
    16 MiB v5e / 32 MiB v6e-v7x default scoped VMEM)."""
    candidates = [t for t in range(128, S, 128) if S % t == 0] + [S]
    fitting = [t for t in candidates if t * bytes_per_col <= budget_bytes]
    if fitting:
        return max(fitting)
    non_full = [t for t in candidates if t != S]
    return min(non_full) if non_full else S


def transition_forward(x_nchw, gamma, beta, running_mean, running_var, conv_w,
                       drop_rate=0.0, training=False, eps=1e-5):
    """Forward of Transition: avg_pool2d(conv1(relu(bn1(x))), 2) [-> dropout]."""
    N, C, H, W = x_nchw.shape
    Cout = conv_w.shape[0]
    assert H % 2 == 0 and W % 2 == 0, "2x2 average pool needs even H and W"
    Hp, Wp = H // 2, W // 2
    S = Hp * Wp
    f32 = jnp.float32

    # Fold BatchNorm (inference mode, running stats) into per-channel scale/shift.
    inv_std = 1.0 / jnp.sqrt(running_var.astype(f32) + eps)
    scale = (gamma.astype(f32) * inv_std).reshape(C, 1)
    shift = (beta.astype(f32)
             - running_mean.astype(f32) * gamma.astype(f32) * inv_std).reshape(C, 1)

    # Conv2d weight (Cout, C, 1, 1) -> (Cout, C); fold the 1/4 pool factor, bf16 for MXU.
    w = (conv_w.reshape(Cout, C).astype(f32) * 0.25).astype(jnp.bfloat16)

    # One input transpose: x4[n, 2a+b, c, i*Wp+j] == x[n, c, 2i+a, 2j+b].
    x4 = (x_nchw.reshape(N, C, Hp, 2, Wp, 2)
                .transpose(0, 3, 5, 1, 2, 4)
                .reshape(N, 4, C, S)
                .astype(jnp.bfloat16))

    # Tile the pooled-spatial axis; grid is (batch, spatial tiles), both parallel.
    bytes_per_col = 4 * C * 2 + Cout * 4        # bf16 x4 tile column + f32 out column
    TS = _choose_spatial_tile(S, bytes_per_col)
    grid = (N, S // TS)

    cost = pl.CostEstimate(
        flops=int(2 * N * S * C * Cout + 6 * N * S * C),
        transcendentals=0,
        bytes_accessed=int(N * 4 * C * S * 2 + Cout * C * 2 + N * Cout * S * 4 + 2 * C * 4),
    )

    out_flat = pl.pallas_call(
        _transition_kernel,
        out_shape=jax.ShapeDtypeStruct((N, Cout, S), f32),
        grid=grid,
        in_specs=[
            pl.BlockSpec((1, 4, C, TS), lambda n, t: (n, 0, 0, t)),
            pl.BlockSpec((C, 1), lambda n, t: (0, 0)),
            pl.BlockSpec((C, 1), lambda n, t: (0, 0)),
            pl.BlockSpec((Cout, C), lambda n, t: (0, 0)),
        ],
        out_specs=pl.BlockSpec((1, Cout, TS), lambda n, t: (n, 0, t)),
        compiler_params=pltpu.CompilerParams(
            dimension_semantics=("parallel", "parallel")),
        cost_estimate=cost,
    )(x4, scale, shift, w)

    # F.dropout with training=False is the identity regardless of drop_rate.
    # TODO(synk): training-mode dropout (pltpu PRNG mask, applied after the pool)
    # is not implemented; this reproduces the eval-mode forward.
    del drop_rate, training

    # (N, Cout, Hp*Wp) -> NCHW is a free reshape (no output transpose needed).
    return out_flat.reshape(N, Cout, Hp, Wp)


def _reference(x, gamma, beta, rm, rv, conv_w, eps=1e-5):
    """Plain-JAX f32 reference of the same (eval-mode) forward."""
    Cout, C = conv_w.shape[0], conv_w.shape[1]
    xn = (x - rm[None, :, None, None]) / jnp.sqrt(rv[None, :, None, None] + eps)
    xn = xn * gamma[None, :, None, None] + beta[None, :, None, None]
    xn = jnp.maximum(xn, 0.0)
    y = jnp.einsum('nchw,oc->nohw', xn, conv_w.reshape(Cout, C))
    N, Co, H, W = y.shape
    return y.reshape(N, Co, H // 2, 2, W // 2, 2).mean(axis=(3, 5))


if __name__ == "__main__":
    # Module config (small, consistent with the forward): nChannels=4, nOutChannels=8
    N, C, H, W = 2, 4, 16, 16
    Cout = 8

    key = jax.random.PRNGKey(0)
    kx, kw, kg, kb, km, kv = jax.random.split(key, 6)

    x = jax.random.normal(kx, (N, C, H, W), dtype=jnp.float32)
    conv_w = jax.random.normal(kw, (Cout, C, 1, 1), dtype=jnp.float32) * 0.1
    gamma = 1.0 + 0.1 * jax.random.normal(kg, (C,), dtype=jnp.float32)
    beta = 0.1 * jax.random.normal(kb, (C,), dtype=jnp.float32)
    running_mean = 0.1 * jax.random.normal(km, (C,), dtype=jnp.float32)
    running_var = jax.random.uniform(kv, (C,), minval=0.5, maxval=1.5, dtype=jnp.float32)

    fwd = jax.jit(transition_forward)
    out = fwd(x, gamma, beta, running_mean, running_var, conv_w)
    out = jax.block_until_ready(out)

    ref = _reference(x, gamma, beta, running_mean, running_var, conv_w)
    # bf16 MXU operands -> looser tolerance than the pure-f32 path.
    np.testing.assert_allclose(np.asarray(out), np.asarray(ref), rtol=2e-2, atol=2e-2)
    assert out.shape == (N, Cout, H // 2, W // 2)

    print("KERNEL_OK")
</pallas_src>

<mosaic_0001>
module attributes {stable_mosaic.version = 11 : i64} {
  func.func @_transition_kernel(%arg0: i32, %arg1: i32, %arg2: memref<1x4x4x64xbf16, #tpu.memory_space<vmem>>, %arg3: memref<4x1xf32, #tpu.memory_space<vmem>>, %arg4: memref<4x1xf32, #tpu.memory_space<vmem>>, %arg5: memref<8x4xbf16, #tpu.memory_space<vmem>>, %arg6: memref<1x8x64xf32, #tpu.memory_space<vmem>>) attributes {dimension_semantics = [#tpu.dimension_semantics<parallel>, #tpu.dimension_semantics<parallel>], iteration_bounds = array<i64: 2, 1>, scalar_prefetch = 0 : i64, scratch_operands = 0 : i64, tpu.core_type = #tpu.core_type<tc>, window_params = [{transform_indices = @transform_0, window_bounds = array<i64: 1, 4, 4, 64>}, {pipeline_mode = #tpu.pipeline_mode<synchronous>, transform_indices = @transform_1, window_bounds = array<i64: 4, 1>}, {pipeline_mode = #tpu.pipeline_mode<synchronous>, transform_indices = @transform_2, window_bounds = array<i64: 4, 1>}, {pipeline_mode = #tpu.pipeline_mode<synchronous>, transform_indices = @transform_3, window_bounds = array<i64: 8, 4>}, {transform_indices = @transform_4, window_bounds = array<i64: 1, 8, 64>}]} {
    %c0 = arith.constant 0 : index
    %c0_0 = arith.constant 0 : index
    %c0_1 = arith.constant 0 : index
    %c0_2 = arith.constant 0 : index
    %0 = vector.load %arg2[%c0, %c0_0, %c0_1, %c0_2] : memref<1x4x4x64xbf16, #tpu.memory_space<vmem>>, vector<1x4x4x64xbf16>
    %1 = vector.shape_cast %0 : vector<1x4x4x64xbf16> to vector<4x4x64xbf16>
    %2 = arith.extf %1 : vector<4x4x64xbf16> to vector<4x4x64xf32>
    %c0_3 = arith.constant 0 : index
    %c0_4 = arith.constant 0 : index
    %3 = vector.load %arg3[%c0_3, %c0_4] : memref<4x1xf32, #tpu.memory_space<vmem>>, vector<4x1xf32>
    %4 = vector.shape_cast %3 : vector<4x1xf32> to vector<1x4x1xf32>
    %5 = vector.broadcast %4 : vector<1x4x1xf32> to vector<4x4x64xf32>
    %6 = arith.mulf %2, %5 : vector<4x4x64xf32>
    %c0_5 = arith.constant 0 : index
    %c0_6 = arith.constant 0 : index
    %7 = vector.load %arg4[%c0_5, %c0_6] : memref<4x1xf32, #tpu.memory_space<vmem>>, vector<4x1xf32>
    %8 = vector.shape_cast %7 : vector<4x1xf32> to vector<1x4x1xf32>
    %9 = vector.broadcast %8 : vector<1x4x1xf32> to vector<4x4x64xf32>
    %10 = arith.addf %6, %9 : vector<4x4x64xf32>
    %cst = arith.constant 0.000000e+00 : f32
    %11 = vector.broadcast %cst : f32 to vector<4x4x64xf32>
    %12 = arith.maximumf %10, %11 : vector<4x4x64xf32>
    %13 = vector.extract_strided_slice %12 {offsets = [0, 0, 0], sizes = [1, 4, 64], strides = [1, 1, 1]} : vector<4x4x64xf32> to vector<1x4x64xf32>
    %14 = vector.shape_cast %13 : vector<1x4x64xf32> to vector<4x64xf32>
    %15 = vector.extract_strided_slice %12 {offsets = [1, 0, 0], sizes = [1, 4, 64], strides = [1, 1, 1]} : vector<4x4x64xf32> to vector<1x4x64xf32>
    %16 = vector.shape_cast %15 : vector<1x4x64xf32> to vector<4x64xf32>
    %17 = arith.addf %14, %16 : vector<4x64xf32>
    %18 = vector.extract_strided_slice %12 {offsets = [2, 0, 0], sizes = [1, 4, 64], strides = [1, 1, 1]} : vector<4x4x64xf32> to vector<1x4x64xf32>
    %19 = vector.shape_cast %18 : vector<1x4x64xf32> to vector<4x64xf32>
    %20 = arith.addf %17, %19 : vector<4x64xf32>
    %21 = vector.extract_strided_slice %12 {offsets = [3, 0, 0], sizes = [1, 4, 64], strides = [1, 1, 1]} : vector<4x4x64xf32> to vector<1x4x64xf32>
    %22 = vector.shape_cast %21 : vector<1x4x64xf32> to vector<4x64xf32>
    %23 = arith.addf %20, %22 : vector<4x64xf32>
    %24 = arith.truncf %23 : vector<4x64xf32> to vector<4x64xbf16>
    %c0_7 = arith.constant 0 : index
    %c0_8 = arith.constant 0 : index
    %25 = vector.load %arg5[%c0_7, %c0_8] : memref<8x4xbf16, #tpu.memory_space<vmem>>, vector<8x4xbf16>
    %cst_9 = arith.constant dense<0.000000e+00> : vector<8x64xf32>
    %26 = tpu.matmul %25, %24, %cst_9 {dimension_numbers = #tpu.dot_dimension_numbers<[1], [0], [0], [1], [0, 0, 1, 1], [], []>} : vector<8x4xbf16>, vector<4x64xbf16>, vector<8x64xf32> -> vector<8x64xf32>
    %c0_10 = arith.constant 0 : index
    %c0_11 = arith.constant 0 : index
    %c0_12 = arith.constant 0 : index
    %27 = vector.load %arg6[%c0_10, %c0_11, %c0_12] : memref<1x8x64xf32, #tpu.memory_space<vmem>>, vector<1x8x64xf32>
    %28 = vector.shape_cast %27 : vector<1x8x64xf32> to vector<8x64xf32>
    %29 = vector.shape_cast %26 : vector<8x64xf32> to vector<1x8x64xf32>
    tpu.vector_store %arg6[%c0_10, %c0_11, %c0_12], %29 {strides = array<i32>} : memref<1x8x64xf32, #tpu.memory_space<vmem>>, vector<1x8x64xf32>,
    return
  }
  func.func @transform_0(%arg0: i32, %arg1: i32) -> (i32, i32, i32, i32) {
    %c0_i32 = arith.constant 0 : i32
    %c0_i32_0 = arith.constant 0 : i32
    %c0_i32_1 = arith.constant 0 : i32
    return %arg0, %c0_i32, %c0_i32_0, %arg1 : i32, i32, i32, i32
  }
  func.func @transform_1(%arg0: i32, %arg1: i32) -> (i32, i32) {
    %c0_i32 = arith.constant 0 : i32
    %c0_i32_0 = arith.constant 0 : i32
    %c0_i32_1 = arith.constant 0 : i32
    return %c0_i32, %c0_i32_0 : i32, i32
  }
  func.func @transform_2(%arg0: i32, %arg1: i32) -> (i32, i32) {
    %c0_i32 = arith.constant 0 : i32
    %c0_i32_0 = arith.constant 0 : i32
    %c0_i32_1 = arith.constant 0 : i32
    return %c0_i32, %c0_i32_0 : i32, i32
  }
  func.func @transform_3(%arg0: i32, %arg1: i32) -> (i32, i32) {
    %c0_i32 = arith.constant 0 : i32
    %c0_i32_0 = arith.constant 0 : i32
    %c0_i32_1 = arith.constant 0 : i32
    return %c0_i32, %c0_i32_0 : i32, i32
  }
  func.func @transform_4(%arg0: i32, %arg1: i32) -> (i32, i32, i32) {
    %c0_i32 = arith.constant 0 : i32
    %c0_i32_0 = arith.constant 0 : i32
    return %arg0, %c0_i32, %arg1 : i32, i32, i32
  }
}

</mosaic_0001>

<bundles_post_ra>
// kernel: transition_forward.1
= control target key start
LH: loop header
LB: loop body
LE: loop exit
PB: predicated region body
PF: predicated region fallthrough
CT: control target
= control target key end

     0   :  { %s492_s15 = smov 0   ;;  %s494_s16 = smov 0   ;;  %s541_s0 = inlined_call_operand.vmem [shape: bf16[2,4,4,64], index: 0, kind: input, shape index: {}]   ;;  %s542_s1 = inlined_call_operand.vmem [shape: f32[4,1], index: 1, kind: input, shape index: {}]   ;;  %s543_s2 = inlined_call_operand.vmem [shape: f32[4,1], index: 2, kind: input, shape index: {}]   ;;  %s544_s3 = inlined_call_operand.vmem [shape: bf16[8,4], index: 3, kind: input, shape index: {}]   ;;  %s545_s4 = inlined_call_operand.vmem [shape: f32[2,8,64], index: 4, kind: output, shape index: {}]  }
   0x1   :  { %s496_s17 = smov 0  }
   0x2 LB: > { %s26_s18 = sadd.s32 1, %s458_s16  ;;  %p396_p0 = scmp.ge.s32.totalorder %s462_s17, 1  ;;  %s462_s17 = sphi %s496_s17, %s14_s17   ;;  %s458_s16 = sphi %s494_s16, %s547_s16   ;;  %s454_s15 = sphi %s492_s15, %s546_s15  }
   0x3   : > { %p28_p1 = scmp.ge.s32.totalorder %s26_s18, 2  ;;  %p181_p2 = scmp.lt.s32.totalorder %s462_s17, 3 }
   0x5   : > { %s549_s18 = smov (%p28_p1, %s26_s18), 0  ;;  %p182_p3 = pnand %p396_p0, %p181_p2 }
   0x6   : > { %p212_p4 = scmp.lt.s32.totalorder (!%p182_p3), %s454_s15, 1 }
   0x7   : > { %185 = sbr.rel (%p182_p3) target bundleno = 357 (0x165), region = 36 }
   0xc   : > { %v236_v0 = vld [vmem:[%s542_s1] sm:$0xf]  ;;  %v464_v1 = vmov 0   ;;  %v465_v3 = vmov 0.0   ;;  %vm466_vm0 = vmmov 0   ;;  %s551_s15 = smov (!%p212_p4, %s454_s15), 1 }
   0xd   : > { %439 = vset.pattern.permute.xlu0 %v464_v1  ;;  %v246_v2 = vld [vmem:[%s543_s2] sm:$0xf]  ;;  %406 = vmatprep.subr.bf16.mxu0 %v465_v3  ;;  %s403_s23 = sshll.u32 %s551_s15, 3  ;;  %vm269_vm1 = vcmask 1041408   ;;  %vm265_vm2 = vcmask 31744   ;;  %vm313_vm3 = vcmask 523264  }
   0xe   : > { %239 = vperm.xlu0 %439, %v236_v0   ;;  %408 = vmatprep.mubr.msk.bf16.mxu0 %vm466_vm0, %v465_v3  ;;  %s219_s26 = scalar_lea.vmem %s541_s0, %s403_s23  ;;  %v264_v31 = vld [vmem:[%s544_s3] sm:$0xf]  ;;  %s226_s5 = scalar_lea.vmem %s545_s4, %s403_s23 }
   0xf   : > { %v228_v4 = vld [vmem:[%s219_s26] sm:$0x3]  ;;  %v229_v5 = vld [vmem:[%s219_s26 + $0x2] sm:$0x3]  ;;  %v230_v6 = vld [vmem:[%s219_s26 + $0x4] sm:$0x3] }
  0x10   : > { %v231_v7 = vld [vmem:[%s219_s26 + $0x6] sm:$0x3]  ;;  %v232_v8 = vunpack.c.l.bf16 %v228_v4  ;;  %v233_v9 = vunpack.c.l.bf16 %v229_v5  ;;  %v234_v10 = vunpack.c.l.bf16 %v230_v6 }
  0x11   : > { %v235_v12 = vunpack.c.l.bf16 %v231_v7 }
  0x12   : > { %249 = vperm.xlu0 %439, %v246_v2  }
  0x89   : > { %v240_v11 = vpop.permute.xlu0 %239 }
  0x8a   : > { %v242_v13 = vmul.f32 %v240_v11, %v232_v8  ;;  %v243_v14 = vmul.f32 %v240_v11, %v233_v9  ;;  %v244_v15 = vmul.f32 %v240_v11, %v234_v10  ;;  %v245_v17 = vmul.f32 %v240_v11, %v235_v12 }
  0x8d   : > { %v250_v16 = vpop.permute.xlu0 %249 }
  0x8e   : > { %v252_v18 = vadd.f32 %v250_v16, %v242_v13  ;;  %v253_v19 = vadd.f32 %v250_v16, %v243_v14  ;;  %v254_v20 = vadd.f32 %v250_v16, %v244_v15  ;;  %v255_v21 = vadd.f32 %v250_v16, %v245_v17 }
  0x90   : > { %v256_v22 = vmax.f32 %v252_v18, 0.0  ;;  %v257_v23 = vmax.f32 %v253_v19, 0.0  ;;  %v258_v24 = vmax.f32 %v254_v20, 0.0  ;;  %v259_v26 = vmax.f32 %v255_v21, 0.0 }
  0x92   : > { %v260_v25 = vadd.f32 %v257_v23, %v256_v22 }
  0x94   : > { %v261_v27 = vadd.f32 %v260_v25, %v258_v24 }
  0x96   : > { %v262_v28 = vadd.f32 %v261_v27, %v259_v26 }
  0x98   : > { %v263_v29 = vpack.c.bf16 %v262_v28, %v262_v28 }
  0x9a   : > { %v271_v30 = vsel %vm269_vm1, %v263_v29, 0 }
  0x9b   : > { %407 = vmatpush3.bf16.msra.mxu0 %v271_v30 }
  0x9e   : > { %409 = vmatmul.mubr.msk.bf16.vlgmr.msra.gmra.mxu0 %vm265_vm2, %v264_v31 }
 0x15e   : > { %v307_v32 = vpop.f32.mrf.mxu0 }
 0x15f   : > { %314 = vst.msk [vmem:[%s226_s5] sm:$0xff] %vm313_vm3, %v307_v32 }
 0x160   : > { %v410_v33 = vpop.f32.mrf.mxu0 }
 0x162   : > { %v310_v34 = vpop.f32.mrf.mxu0 }
 0x164   : > { %v411_v35 = vpop.f32.mrf.mxu0 }
 0x165 PF: > { %s14_s17 = sadd.s32 1, %s462_s17   ;;  %s546_s15 = smov %s458_s16 }
 0x166   : > { %p11_p5 = scmp.ge.s32.totalorder %s14_s17, 4   ;;  %s547_s16 = smov %s549_s18 }
 0x168   :  { %13 = sbr.rel (!%p11_p5) target bundleno = 2 (0x2), region = 66 }

</bundles_post_ra>
